<compile_context>
chip_gen: v6e
topology: v6e:2x2x1
jax: 0.10.0
libtpu: 0.0.40
codegen_flags: <defaults>
</compile_context>

<pallas_src>
import functools
import math

import jax
import jax.numpy as jnp
from jax.experimental import pallas as pl
from jax.experimental.pallas import tpu as pltpu


# ---------------------------------------------------------------------------
# Tile-size helper: largest aligned tile <= target that divides dim
# (falls back to the full dim, which always satisfies the (8,128) rule).
# ---------------------------------------------------------------------------
def _pick_tile(dim, target, align):
    if dim <= target:
        return dim
    t = (target // align) * align
    while t >= align:
        if dim % t == 0:
            return t
        t -= align
    return dim


# ---------------------------------------------------------------------------
# Tiled linear: out = x @ w + b, w stored pre-transposed as (d_in, d_out).
# Grid = (M/tm, N/tn, K/tk); f32 accumulator in VMEM scratch; bias initializes
# the accumulator at k==0 (added once, not per K step); store at last k.
# ---------------------------------------------------------------------------
def _linear_kernel(x_ref, w_ref, b_ref, o_ref, acc_ref):
    kk = pl.program_id(2)

    @pl.when(kk == 0)
    def _():
        acc_ref[...] = jnp.broadcast_to(
            b_ref[...].astype(jnp.float32), acc_ref.shape
        )

    acc_ref[...] += jnp.dot(
        x_ref[...], w_ref[...], preferred_element_type=jnp.float32
    )

    @pl.when(kk == pl.num_programs(2) - 1)
    def _():
        o_ref[...] = acc_ref[...].astype(o_ref.dtype)


def linear(x2d, w, b, *, tm_target=256, tn_target=256, tk_target=512):
    m, k_dim = x2d.shape
    k2, n = w.shape
    assert k_dim == k2
    tm = _pick_tile(m, tm_target, 8)
    tn = _pick_tile(n, tn_target, 128)
    tk = _pick_tile(k_dim, tk_target, 128)
    grid = (m // tm, n // tn, k_dim // tk)
    return pl.pallas_call(
        _linear_kernel,
        out_shape=jax.ShapeDtypeStruct((m, n), x2d.dtype),
        grid=grid,
        in_specs=[
            pl.BlockSpec((tm, tk), lambda i, j, kk: (i, kk)),
            pl.BlockSpec((tk, tn), lambda i, j, kk: (kk, j)),
            pl.BlockSpec((1, tn), lambda i, j, kk: (0, j)),
        ],
        out_specs=pl.BlockSpec((tm, tn), lambda i, j, kk: (i, j)),
        scratch_shapes=[pltpu.VMEM((tm, tn), jnp.float32)],
        compiler_params=pltpu.CompilerParams(
            dimension_semantics=("parallel", "parallel", "arbitrary"),
            vmem_limit_bytes=32 * 1024 * 1024,
        ),
    )(x2d, w, b.reshape(1, n))


# ---------------------------------------------------------------------------
# Attention core: all heads of one batch element at once.
#   * Q is scaled by 1/sqrt(d_k) once (S*D mults, not S*S).
#   * QK^T via einsum (no materialized K transpose).
#   * softmax normalization via EUP reciprocal + one Newton step.
#   * output written as one lane-dense (S, d_model) block.
# TODO(synk): flash-style KV tiling (online softmax) for S beyond ~2K so the
#             (h, S, S) scores tensor never exceeds VMEM.
# ---------------------------------------------------------------------------
def _attn_math(q2d, k2d, v2d, n_heads, scale, out_dtype):
    s, d = q2d.shape
    d_k = d // n_heads
    q = (q2d.astype(jnp.float32) * scale).reshape(s, n_heads, d_k)
    k = k2d.astype(jnp.float32).reshape(s, n_heads, d_k)
    v = v2d.reshape(s, n_heads, d_k)
    scores = jnp.einsum("qhd,khd->hqk", q, k, preferred_element_type=jnp.float32)
    m = jnp.max(scores, axis=-1, keepdims=True)
    p = jnp.exp(scores - m)
    denom = jnp.sum(p, axis=-1, keepdims=True)
    r = pl.reciprocal(denom, approx=True)
    r = r * (2.0 - denom * r)  # one Newton step -> ~f32 accuracy
    p = p * r
    out = jnp.einsum(
        "hqk,khd->qhd", p.astype(v.dtype), v, preferred_element_type=jnp.float32
    )
    return out.reshape(s, d).astype(out_dtype)


def _attn_kernel_separate(q_ref, k_ref, v_ref, o_ref, *, n_heads, scale):
    o_ref[...] = _attn_math(
        q_ref[...], k_ref[...], v_ref[...], n_heads, scale, o_ref.dtype
    )


def _attn_kernel_packed(qkv_ref, o_ref, *, n_heads, scale):
    d = o_ref.shape[-1]
    qkv = qkv_ref[...]
    o_ref[...] = _attn_math(
        qkv[:, :d], qkv[:, d : 2 * d], qkv[:, 2 * d :], n_heads, scale, o_ref.dtype
    )


def attention_separate(q, k, v, n_heads):
    # q, k, v: (B, S, D)
    b, s, d = q.shape
    scale = 1.0 / math.sqrt(d // n_heads)
    spec = pl.BlockSpec((None, s, d), lambda bi: (bi, 0, 0))
    return pl.pallas_call(
        functools.partial(_attn_kernel_separate, n_heads=n_heads, scale=scale),
        out_shape=jax.ShapeDtypeStruct((b, s, d), q.dtype),
        grid=(b,),
        in_specs=[spec, spec, spec],
        out_specs=spec,
        compiler_params=pltpu.CompilerParams(
            dimension_semantics=("parallel",),
            vmem_limit_bytes=32 * 1024 * 1024,
        ),
    )(q, k, v)


def attention_packed(qkv, n_heads, d_model):
    # qkv: (B, S, 3*D) — columns are [Q | K | V] from the fused projection.
    b, s, d3 = qkv.shape
    scale = 1.0 / math.sqrt(d_model // n_heads)
    return pl.pallas_call(
        functools.partial(_attn_kernel_packed, n_heads=n_heads, scale=scale),
        out_shape=jax.ShapeDtypeStruct((b, s, d_model), qkv.dtype),
        grid=(b,),
        in_specs=[pl.BlockSpec((None, s, d3), lambda bi: (bi, 0, 0))],
        out_specs=pl.BlockSpec((None, s, d_model), lambda bi: (bi, 0, 0)),
        compiler_params=pltpu.CompilerParams(
            dimension_semantics=("parallel",),
            vmem_limit_bytes=32 * 1024 * 1024,
        ),
    )(qkv)


# ---------------------------------------------------------------------------
# MultiHeadedAttention (eval-mode forward; dropout is identity in eval).
# ---------------------------------------------------------------------------
class MultiHeadedAttentionPallas:
    def __init__(self, h, d_model, key):
        assert d_model % h == 0
        self.h = h
        self.d_k = d_model // h
        self.d_model = d_model
        bound = 1.0 / math.sqrt(d_model)  # mimics nn.Linear U(-1/sqrt(fan_in), ...)
        keys = jax.random.split(key, 8)
        ws, bs = [], []
        for i in range(4):
            ws.append(
                jax.random.uniform(
                    keys[2 * i], (d_model, d_model), jnp.float32, -bound, bound
                )
            )
            bs.append(
                jax.random.uniform(
                    keys[2 * i + 1], (d_model,), jnp.float32, -bound, bound
                )
            )
        self.weights = ws  # stored (d_in, d_out) == W.T
        self.biases = bs
        # Fused QKV params for the self-attention fast path (x read once,
        # 3x wider N tile on the MXU).
        self.w_qkv = jnp.concatenate(ws[:3], axis=1)  # (D, 3D)
        self.b_qkv = jnp.concatenate(bs[:3], axis=0)  # (3D,)

    def __call__(self, query, key, value, mask=None):
        # TODO(synk): mask path (masked_fill -1e9), sparsemax variant and
        # training-mode dropout are not implemented (eval / mask=None only).
        assert mask is None
        s, nb, dm = query.shape

        def to_batch_major(x):  # (S, B, D) -> (B*S, D), batch-major rows
            return jnp.transpose(x, (1, 0, 2)).reshape(nb * s, dm)

        if (query is key) and (key is value):
            # Self-attention: one fused QKV matmul.
            x2d = to_batch_major(query)
            qkv = linear(x2d, self.w_qkv, self.b_qkv)  # (B*S, 3D)
            ctx = attention_packed(qkv.reshape(nb, s, 3 * dm), self.h, dm)
        else:
            q2d = linear(to_batch_major(query), self.weights[0], self.biases[0])
            k2d = linear(to_batch_major(key), self.weights[1], self.biases[1])
            v2d = linear(to_batch_major(value), self.weights[2], self.biases[2])
            ctx = attention_separate(
                q2d.reshape(nb, s, dm),
                k2d.reshape(nb, s, dm),
                v2d.reshape(nb, s, dm),
                self.h,
            )
        out = linear(ctx.reshape(nb * s, dm), self.weights[3], self.biases[3])
        return jnp.transpose(out.reshape(nb, s, dm), (1, 0, 2))  # (S, B, D)


# ---------------------------------------------------------------------------
# Pure-JAX reference (mirrors the PyTorch math exactly, in (S, B, D) layout).
# ---------------------------------------------------------------------------
def _reference(mha, query, key, value):
    s, nb, dm = query.shape

    def proj(x, w, b):
        y = x.reshape(s * nb, dm) @ w + b
        return jnp.transpose(y.reshape(s, nb, mha.h, mha.d_k), (2, 1, 0, 3))

    q = proj(query, mha.weights[0], mha.biases[0])
    k = proj(key, mha.weights[1], mha.biases[1])
    v = proj(value, mha.weights[2], mha.biases[2])
    scores = jnp.einsum("hbqd,hbkd->hbqk", q, k) / math.sqrt(mha.d_k)
    p = jax.nn.softmax(scores, axis=-1)
    x = jnp.einsum("hbqk,hbkd->hbqd", p, v)
    x = jnp.transpose(x, (2, 1, 0, 3)).reshape(s * nb, dm)
    return (x @ mha.weights[3] + mha.biases[3]).reshape(s, nb, dm)


if __name__ == "__main__":
    seq, batch, d_model, n_heads = 8, 2, 32, 4
    root = jax.random.PRNGKey(0)
    k_param, k_q, k_k, k_v = jax.random.split(root, 4)

    mha = MultiHeadedAttentionPallas(n_heads, d_model, k_param)

    query = jax.random.normal(k_q, (seq, batch, d_model), jnp.float32)
    key = jax.random.normal(k_k, (seq, batch, d_model), jnp.float32)
    value = jax.random.normal(k_v, (seq, batch, d_model), jnp.float32)

    # Cross-attention style call (distinct q/k/v -> three tiled projections).
    out = mha(query, key, value)
    jax.block_until_ready(out)
    ref = _reference(mha, query, key, value)
    assert out.shape == (seq, batch, d_model)
    assert jnp.allclose(out, ref, atol=1e-4, rtol=1e-4), float(
        jnp.max(jnp.abs(out - ref))
    )

    # Self-attention call (fused QKV fast path).
    out_self = mha(query, query, query)
    jax.block_until_ready(out_self)
    ref_self = _reference(mha, query, query, query)
    assert jnp.allclose(out_self, ref_self, atol=1e-4, rtol=1e-4), float(
        jnp.max(jnp.abs(out_self - ref_self))
    )

    print("KERNEL_OK")
</pallas_src>

<mosaic_0001>
module attributes {stable_mosaic.version = 11 : i64} {
  func.func @_linear_kernel(%arg0: i32, %arg1: i32, %arg2: i32, %arg3: memref<16x32xf32, #tpu.memory_space<vmem>>, %arg4: memref<32x32xf32, #tpu.memory_space<vmem>>, %arg5: memref<1x32xf32, #tpu.memory_space<vmem>>, %arg6: memref<16x32xf32, #tpu.memory_space<vmem>>, %arg7: memref<16x32xf32, #tpu.memory_space<vmem>>) attributes {dimension_semantics = [#tpu.dimension_semantics<parallel>, #tpu.dimension_semantics<parallel>, #tpu.dimension_semantics<arbitrary>], iteration_bounds = array<i64: 1, 1, 1>, scalar_prefetch = 0 : i64, scratch_operands = 1 : i64, tpu.core_type = #tpu.core_type<tc>, window_params = [{transform_indices = @transform_0, window_bounds = array<i64: 16, 32>}, {transform_indices = @transform_1, window_bounds = array<i64: 32, 32>}, {transform_indices = @transform_2, window_bounds = array<i64: 1, 32>}, {transform_indices = @transform_3, window_bounds = array<i64: 16, 32>}]} {
    %c0_i32 = arith.constant 0 : i32
    %0 = arith.cmpi eq, %arg2, %c0_i32 : i32
    %1 = arith.extui %0 : i1 to i32
    %c0_i32_0 = arith.constant 0 : i32
    %2 = arith.cmpi ne, %1, %c0_i32_0 : i32
    scf.if %2 {
      %c0_10 = arith.constant 0 : index
      %c0_11 = arith.constant 0 : index
      %12 = vector.load %arg5[%c0_10, %c0_11] : memref<1x32xf32, #tpu.memory_space<vmem>>, vector<1x32xf32>
      %13 = vector.shape_cast %12 : vector<1x32xf32> to vector<1x32xf32>
      %14 = vector.broadcast %13 : vector<1x32xf32> to vector<16x32xf32>
      %c0_12 = arith.constant 0 : index
      %c0_13 = arith.constant 0 : index
      %15 = vector.load %arg7[%c0_12, %c0_13] : memref<16x32xf32, #tpu.memory_space<vmem>>, vector<16x32xf32>
      tpu.vector_store %arg7[%c0_12, %c0_13], %14 {strides = array<i32>} : memref<16x32xf32, #tpu.memory_space<vmem>>, vector<16x32xf32>,
    } else {
    }
    %c0 = arith.constant 0 : index
    %c0_1 = arith.constant 0 : index
    %3 = vector.load %arg7[%c0, %c0_1] : memref<16x32xf32, #tpu.memory_space<vmem>>, vector<16x32xf32>
    %c0_2 = arith.constant 0 : index
    %c0_3 = arith.constant 0 : index
    %4 = vector.load %arg3[%c0_2, %c0_3] : memref<16x32xf32, #tpu.memory_space<vmem>>, vector<16x32xf32>
    %c0_4 = arith.constant 0 : index
    %c0_5 = arith.constant 0 : index
    %5 = vector.load %arg4[%c0_4, %c0_5] : memref<32x32xf32, #tpu.memory_space<vmem>>, vector<32x32xf32>
    %cst = arith.constant dense<0.000000e+00> : vector<16x32xf32>
    %6 = tpu.matmul %4, %5, %cst {dimension_numbers = #tpu.dot_dimension_numbers<[1], [0], [0], [1], [0, 0, 1, 1], [], []>} : vector<16x32xf32>, vector<32x32xf32>, vector<16x32xf32> -> vector<16x32xf32>
    %7 = arith.addf %3, %6 : vector<16x32xf32>
    %c0_6 = arith.constant 0 : index
    %c0_7 = arith.constant 0 : index
    %8 = vector.load %arg7[%c0_6, %c0_7] : memref<16x32xf32, #tpu.memory_space<vmem>>, vector<16x32xf32>
    tpu.vector_store %arg7[%c0_6, %c0_7], %7 {strides = array<i32>} : memref<16x32xf32, #tpu.memory_space<vmem>>, vector<16x32xf32>,
    %c0_i32_8 = arith.constant 0 : i32
    %9 = arith.cmpi eq, %arg2, %c0_i32_8 : i32
    %10 = arith.extui %9 : i1 to i32
    %c0_i32_9 = arith.constant 0 : i32
    %11 = arith.cmpi ne, %10, %c0_i32_9 : i32
    scf.if %11 {
      %c0_10 = arith.constant 0 : index
      %c0_11 = arith.constant 0 : index
      %12 = vector.load %arg7[%c0_10, %c0_11] : memref<16x32xf32, #tpu.memory_space<vmem>>, vector<16x32xf32>
      %c0_12 = arith.constant 0 : index
      %c0_13 = arith.constant 0 : index
      %13 = vector.load %arg6[%c0_12, %c0_13] : memref<16x32xf32, #tpu.memory_space<vmem>>, vector<16x32xf32>
      tpu.vector_store %arg6[%c0_12, %c0_13], %12 {strides = array<i32>} : memref<16x32xf32, #tpu.memory_space<vmem>>, vector<16x32xf32>,
    } else {
    }
    return
  }
  func.func @transform_0(%arg0: i32, %arg1: i32, %arg2: i32) -> (i32, i32) {
    %c0_i32 = arith.constant 0 : i32
    return %arg0, %arg2 : i32, i32
  }
  func.func @transform_1(%arg0: i32, %arg1: i32, %arg2: i32) -> (i32, i32) {
    %c0_i32 = arith.constant 0 : i32
    return %arg2, %arg1 : i32, i32
  }
  func.func @transform_2(%arg0: i32, %arg1: i32, %arg2: i32) -> (i32, i32) {
    %c0_i32 = arith.constant 0 : i32
    %c0_i32_0 = arith.constant 0 : i32
    return %c0_i32, %arg1 : i32, i32
  }
  func.func @transform_3(%arg0: i32, %arg1: i32, %arg2: i32) -> (i32, i32) {
    %c0_i32 = arith.constant 0 : i32
    return %arg0, %arg1 : i32, i32
  }
}

</mosaic_0001>

<bundles_post_ra>
// kernel: tpu_custom_call.1
= control target key start
LH: loop header
LB: loop body
LE: loop exit
PB: predicated region body
PF: predicated region fallthrough
CT: control target
= control target key end

     0   :  { %8 = vsyncpa [#allocation4], 0  ;;  %s321_s0 = inlined_call_operand.hbm [shape: f32[16,32], index: 0, kind: input, shape index: {}]   ;;  %s322_s1 = inlined_call_operand.hbm [shape: f32[32,32], index: 1, kind: input, shape index: {}]   ;;  %s323_s2 = inlined_call_operand.vmem [shape: f32[1,32], index: 2, kind: input, shape index: {}]   ;;  %s324_s3 = inlined_call_operand.hbm [shape: f32[16,32], index: 3, kind: output, shape index: {}]  }
   0x1   :  { %9 = vsyncpa [#allocation7], 0 }
   0x2   :  { %10 = vsyncpa [#allocation5], 0  ;;  %s267_s12 = smov [#allocation3]  }
   0x3   :  { %s16_s13 = sshll.u32 %s267_s12, 4  ;;  %s17_s13 = int_to_ptr.vmem [resolvable:$true] %s16_s13 }
   0x4   :  { %s209_s14 = scalar_lea.vmem %s17_s13, 256  ;;  %p214_p1 = scmp.lt.s32.totalorder %s17_s13, %s17_s13 }
   0x5   :  { %p210_p0 = scmp.ne.s32.totalorder %s17_s13, %s209_s14  ;;  %p215_p2 = scmp.lt.s32.totalorder %s209_s14, %s209_s14 }
   0x7   :  { %p216_p3 = por %p215_p2, %p214_p1 }
   0x9   :  { %p217_p4 = pnand %p216_p3, %p210_p0 }
   0xb   :  { %220 = shalt.err (!%p217_p4)
}
   0xc   :  { %s268_s15 = smov 128   ;;  %s269_s16 = smov 8  }
   0xd   :  { %22 = dma.hbm_to_vmem [thread:$0]  %s321_s0, 256, %s17_s13, [#allocation4], %s268_s15, %s268_s15, %s269_s16  }
   0xe   :  { %s270_s19 = smov [#allocation6]  }
   0xf   :  { %s28_s20 = sshll.u32 %s270_s19, 4  ;;  %s29_s20 = int_to_ptr.vmem [resolvable:$true] %s28_s20 }
  0x10   :  { %s229_s21 = scalar_lea.vmem %s29_s20, 512  ;;  %p234_p6 = scmp.lt.s32.totalorder %s29_s20, %s29_s20 }
  0x11   :  { %p230_p5 = scmp.ne.s32.totalorder %s29_s20, %s229_s21  ;;  %p235_p7 = scmp.lt.s32.totalorder %s229_s21, %s229_s21 }
  0x13   :  { %p236_p8 = por %p235_p7, %p234_p6 }
  0x15   :  { %p237_p9 = pnand %p236_p8, %p230_p5 }
  0x17   :  { %240 = shalt.err (!%p237_p9)
}
  0x18   :  { %34 = dma.hbm_to_vmem [thread:$0]  %s322_s1, 512, %s29_s20, [#allocation7], %s268_s15, %s268_s15, %s269_s16  }
  0x19   :  { %261 = dma.done.wait [#allocation4], 256  }
  0x1a   :  { %262 = vsyncadd [#allocation4], 4294967040 }
  0x1b   :  { %263 = dma.done.wait [#allocation7], 512  }
  0x1c   :  { %264 = vsyncadd [#allocation7], 4294966784  ;;  %vm54_vm0 = vcmask 261120   ;;  %v64_v0 = vld [vmem:[#allocation6 + $0x18] sm:$0xff]  ;;  %v63_v1 = vld [vmem:[#allocation6 + $0x10] sm:$0xff]  ;;  %s271_s1 = smov [#allocation8]  }
  0x1d   :  { %185 = vmatprep.subr.mxu0 %v64_v0  ;;  %v59_v2 = vld [vmem:[#allocation3] sm:$0xff]  ;;  %v62_v3 = vld [vmem:[#allocation6 + $0x8] sm:$0xff]  ;;  %v176_v4 = vld [vmem:[%s323_s2] ss:$0 sm:$0xff]  ;;  %s163_s2 = sshll.u32 %s271_s1, 4  ;;  %s164_s2 = int_to_ptr.vmem [resolvable:$true] %s163_s2 }
  0x1e   :  { %186 = vmatpush3.msra.mxu0 %v64_v0  ;;  %193 = vmatprep.mubr.msk.f32.mxu0 %vm54_vm0, %v59_v2  ;;  %56 = vst.msk [vmem:[#allocation2 + $0x8] sm:$0xff] %vm54_vm0, %v176_v4  ;;  %55 = vst.msk [vmem:[#allocation2] sm:$0xff] %vm54_vm0, %v176_v4  ;;  %v61_v5 = vld [vmem:[#allocation6] sm:$0xff]  ;;  %v60_v6 = vld [vmem:[#allocation3 + $0x8] sm:$0xff]  ;;  %s241_s25 = scalar_lea.vmem %s164_s2, 256  ;;  %p246_p11 = scmp.lt.s32.totalorder %s164_s2, %s164_s2 }
  0x1f   :  { %187 = vmatprep.subr.mxu0 %v63_v1  ;;  %p242_p10 = scmp.ne.s32.totalorder %s164_s2, %s241_s25  ;;  %p247_p12 = scmp.lt.s32.totalorder %s241_s25, %s241_s25 }
  0x20   :  { %188 = vmatpush3.msra.mxu0 %v63_v1 }
  0x21   :  { %189 = vmatprep.subr.mxu0 %v62_v3  ;;  %p248_p13 = por %p247_p12, %p246_p11 }
  0x22   :  { %190 = vmatpush3.msra.mxu0 %v62_v3 }
  0x23   :  { %191 = vmatprep.subr.mxu0 %v61_v5  ;;  %p249_p0 = pnand %p248_p13, %p242_p10 }
  0x24   :  { %192 = vmatpush3.msra.mxu0 %v61_v5 }
  0x25   :  { %194 = vmatmul.mubr.msk.f32.vlgmr.msra.gmra.mxu0 %vm54_vm0, %v60_v6  ;;  %v58_v7 = vld [vmem:[#allocation2 + $0x8] sm:$0xff]  ;;  %v57_v9 = vld [vmem:[#allocation2] sm:$0xff] }
  0xe5   :  { %v195_v8 = vpop.f32.mrf.mxu0 }
  0xe6   :  { %v148_v10 = vadd.f32 %v195_v8, %v58_v7 }
  0xe7   :  { %v138_v11 = vpop.f32.mrf.mxu0 }
  0xe8   :  { %150 = vst.msk [vmem:[#allocation2 + $0x8] sm:$0xff] %vm54_vm0, %v148_v10  ;;  %v147_v12 = vadd.f32 %v138_v11, %v57_v9 }
  0xea   :  { %149 = vst.msk [vmem:[#allocation2] sm:$0xff] %vm54_vm0, %v147_v12 }
  0xef   :  { %v155_v13 = vld [vmem:[#allocation2 + $0x8] sm:$0xff] }
  0xf0   :  { %157 = vst.msk [vmem:[#allocation8 + $0x8] sm:$0xff] %vm54_vm0, %v155_v13 }
  0xf1   :  { %v154_v14 = vld [vmem:[#allocation2] sm:$0xff] }
  0xf2   :  { %156 = vst.msk [vmem:[#allocation8] sm:$0xff] %vm54_vm0, %v154_v14 }
  0xf3   :  { %252 = shalt.err (!%p249_p0)
}
  0xf4   :  { %169 = dma.vmem_to_hbm [thread:$0]  %s164_s2, 256, %s324_s3, [#allocation5], %s268_s15, %s268_s15, %s269_s16  }
  0xf5   :  { %265 = dma.done.wait [#allocation5], 256  }
  0xf6   :  { %266 = vsyncadd [#allocation5], 4294967040 }
  0xf7   :  { %173 = vsyncpa [#allocation4], 1 }
  0xf8   :  { %174 = vsyncpa [#allocation7], 1 }
  0xf9   :  { %175 = vsyncpa [#allocation5], 1 }

</bundles_post_ra>
